<compile_context>
chip_gen: v7x
topology: tpu7x:2x2x1
jax: 0.10.0
libtpu: 0.0.40
codegen_flags: <defaults>
</compile_context>

<pallas_src>
import math
import numpy as np
import jax
import jax.numpy as jnp
from jax.experimental import pallas as pl
from jax.experimental.pallas import tpu as pltpu

W1CAT_N = 128  # fused first-matmul width: [xp (nb) | hidden (64) | zero pad]


def meanasl_kernel(x_ref, wcat1_ref, b1cat_ref, w2pad_ref, b2_ref,
                   logits_ref, xp_ref):
    """One batch tile of the meanASLnet forward (eval mode).

    x_ref     : (TM, nf)  bf16  channel-0 stripe (streamed, channel-major x)
    wcat1_ref : (nf, 128) bf16  fused [seg | seg@W1 | 0]        (resident)
    b1cat_ref : (1, 128)  f32   [0 | b1 | 0]                    (resident)
    w2pad_ref : (128, nc) bf16  [0 ; W2 ; 0] rows aligned w/ wcat1 cols
    b2_ref    : (1, nc)   f32
    logits_ref: (TM, nc)  f32
    xp_ref    : (TM, nb)  f32
    """
    nb = xp_ref.shape[1]
    x0 = x_ref[...].astype(jnp.bfloat16)  # no-op cast when producer gives bf16

    # Single fused MXU pass over x0:
    #   cols [0:nb)     = x0 @ seg        (per-branch AdaptiveAvgPool3d(1) means)
    #   cols [nb:nb+64) = x0 @ (seg @ W1) (classifier Linear-1, pre-bias)
    g = jnp.dot(x0, wcat1_ref[...], preferred_element_type=jnp.float32)  # (TM,128)

    # xp output in full f32 precision (leading lanes, no shuffle needed).
    xp_ref[...] = g[:, :nb]

    # Bias + ReLU over all 128 lanes; the xp / pad lanes are neutralized by the
    # zero rows of w2pad below, so no lane masking is needed.
    h = jnp.maximum(g + b1cat_ref[...], 0.0)

    logits_ref[...] = (
        jnp.dot(h.astype(jnp.bfloat16), w2pad_ref[...],
                preferred_element_type=jnp.float32) + b2_ref[...])


def make_segment_matrix(shapes0, nf):
    """seg[f, i] = 1/prod(shapes0[i]) if feature f belongs to branch i, else 0.

    Matches: imin = shapes0[0:i].prod(axis=1).sum(); imax = imin + shapes0[i].prod()
    and AdaptiveAvgPool3d(1) == mean over the (d0, d1, d2) volume.
    """
    num_branches = shapes0.shape[0]
    seg = np.zeros((nf, num_branches), dtype=np.float32)
    imin = 0
    for i in range(num_branches):
        n_i = int(np.prod(shapes0[i]))
        seg[imin:imin + n_i, i] = 1.0 / n_i
        imin += n_i
    return jnp.asarray(seg)


def init_params(key, num_branches, num_channels, num_classes):
    """Deterministic PyTorch-style Linear init (uniform +/- 1/sqrt(fan_in))."""
    in1 = num_branches * 1 * num_channels
    out1 = 64 * num_channels
    in2, out2 = 64, num_classes
    k1, k2, k3, k4 = jax.random.split(key, 4)
    bound1 = 1.0 / math.sqrt(in1)
    bound2 = 1.0 / math.sqrt(in2)
    # stored transposed: (in_features, out_features)
    w1 = jax.random.uniform(k1, (in1, out1), jnp.float32, -bound1, bound1)
    b1 = jax.random.uniform(k2, (1, out1), jnp.float32, -bound1, bound1)
    w2 = jax.random.uniform(k3, (in2, out2), jnp.float32, -bound2, bound2)
    b2 = jax.random.uniform(k4, (1, out2), jnp.float32, -bound2, bound2)
    return w1, b1, w2, b2


def prepare_kernel_weights(seg, w1, b1, w2):
    """One-time prep: fold seg into W1, fuse into lane-aligned slabs, cast bf16.

    Column layout of Wcat1 / b1cat (and matching row layout of W2pad):
      [0:nb)       -> seg        (xp lanes;      w2pad rows are zero there)
      [nb:nb+64)   -> seg @ W1   (hidden lanes;  w2pad rows carry W2)
      [nb+64:128)  -> zero pad
    """
    nf, nb = seg.shape
    h1 = w1.shape[1]
    nc = w2.shape[1]
    assert nb + h1 <= W1CAT_N
    w1eff = seg @ w1                                                   # (nf, 64) f32
    wcat1 = jnp.zeros((nf, W1CAT_N), jnp.float32)
    wcat1 = wcat1.at[:, :nb].set(seg).at[:, nb:nb + h1].set(w1eff)
    b1cat = jnp.zeros((1, W1CAT_N), jnp.float32).at[:, nb:nb + h1].set(b1)
    w2pad = jnp.zeros((W1CAT_N, nc), jnp.float32).at[nb:nb + h1, :].set(w2)
    return wcat1.astype(jnp.bfloat16), b1cat, w2pad.astype(jnp.bfloat16)


def _round_up(x, m):
    return ((x + m - 1) // m) * m


def mean_asl_net_forward(x_cm, wcat1_bf, b1cat, w2pad_bf, b2, *,
                         num_branches, tm=512):
    """x_cm: (nch, nsub, nf), channel-major, preferably bf16 (producer-side)."""
    nch, nsub, nf = x_cm.shape
    nb = num_branches
    nc = w2pad_bf.shape[1]

    # Batch tile: multiple of 8 sublanes, capped at the batch; keep grid_m >= 2
    # so v7x megacore (dimension_semantics) has work for both TensorCores
    # (harmless no-op on single-TC v5e/v6e).
    tm = max(8, (int(tm) // 8) * 8)
    tm = min(tm, _round_up(nsub, 8))
    if nsub > 8 and pl.cdiv(nsub, tm) < 2:
        tm = _round_up(pl.cdiv(nsub, 2), 8)
    grid_m = pl.cdiv(nsub, tm)
    # TODO(synk): when nsub % tm != 0 we rely on Pallas masked edge blocks
    # (safe here: no cross-row reductions); producers should still prefer
    # batch sizes divisible by tm to avoid a partially-useful last DMA.

    cost = pl.CostEstimate(
        flops=2 * nsub * nf * W1CAT_N + 2 * nsub * W1CAT_N * nc,
        transcendentals=0,
        bytes_accessed=(nsub * nf * x_cm.dtype.itemsize        # channel-0 stripe only
                        + nsub * (nc + nb) * 4                  # narrow f32 outputs
                        + (wcat1_bf.size + w2pad_bf.size) * 2
                        + (b1cat.size + b2.size) * 4),
    )

    grid_spec = pltpu.PrefetchScalarGridSpec(
        num_scalar_prefetch=0,
        grid=(grid_m,),
        in_specs=[
            # Channel-0 stripe of channel-major x: one contiguous (tm, nf) slab
            # per grid step (channel dim squeezed).
            pl.BlockSpec((None, tm, nf), lambda i: (0, i, 0)),
            # Weights: resident across the whole grid (constant index_map).
            pl.BlockSpec((nf, W1CAT_N), lambda i: (0, 0)),
            pl.BlockSpec((1, W1CAT_N), lambda i: (0, 0)),
            pl.BlockSpec((W1CAT_N, nc), lambda i: (0, 0)),
            pl.BlockSpec((1, nc), lambda i: (0, 0)),
        ],
        out_specs=[
            pl.BlockSpec((tm, nc), lambda i: (i, 0)),
            pl.BlockSpec((tm, nb), lambda i: (i, 0)),
        ],
    )

    logits, xp = pl.pallas_call(
        meanasl_kernel,
        out_shape=(jax.ShapeDtypeStruct((nsub, nc), jnp.float32),
                   jax.ShapeDtypeStruct((nsub, nb), jnp.float32)),
        grid_spec=grid_spec,
        compiler_params=pltpu.CompilerParams(
            dimension_semantics=("parallel",)),   # v7x megacore over batch tiles
        cost_estimate=cost,
    )(x_cm, wcat1_bf, b1cat, w2pad_bf, b2)
    return [logits, xp]


if __name__ == "__main__":
    num_classes = 2
    num_channels = 1      # required for the reference classifier dims to compose
    num_branches = 2
    # shapes[0] is a (num_branches, 3) table of per-branch 3D volume shapes.
    shapes0 = np.array([[2, 4, 8],
                        [2, 2, 4]], dtype=np.int64)
    nf = int(shapes0.prod(axis=1).sum())          # 64 + 16 = 80
    nsub, nch = 1024, 4                           # big enough for grid_m = 2

    key = jax.random.PRNGKey(0)
    kx, kp = jax.random.split(key)
    x = jax.random.normal(kx, (nsub, nch, nf), dtype=jnp.float32)  # module layout

    # Producer-side one-time prep: channel-major + bf16 so the channel-0 stripe
    # is a contiguous, half-width DMA inside the kernel.
    # TODO(synk): producers should store x channel-major bf16 to avoid this copy.
    x_cm = jnp.transpose(x, (1, 0, 2)).astype(jnp.bfloat16)        # (nch, nsub, nf)

    seg = make_segment_matrix(shapes0, nf)
    w1, b1, w2, b2 = init_params(kp, num_branches, num_channels, num_classes)
    wcat1_bf, b1cat, w2pad_bf = prepare_kernel_weights(seg, w1, b1, w2)

    logits, xp = mean_asl_net_forward(x_cm, wcat1_bf, b1cat, w2pad_bf, b2,
                                      num_branches=num_branches, tm=512)
    jax.block_until_ready((logits, xp))

    # Pure-f32 JAX reference on the same (bf16-rounded) channel-0 input.  The
    # kernel uses bf16 MXU operands and folds seg into W1, so compare with a
    # modest tolerance.
    x0 = x_cm[0].astype(jnp.float32)
    xp_ref = x0 @ seg
    h_ref = jnp.maximum(xp_ref @ w1 + b1, 0.0)
    logits_ref = h_ref @ w2 + b2
    assert xp.shape == (nsub, num_branches)
    assert logits.shape == (nsub, num_classes)
    assert jnp.allclose(xp, xp_ref, atol=2e-2, rtol=2e-2)
    assert jnp.allclose(logits, logits_ref, atol=2e-2, rtol=2e-2)

    print("KERNEL_OK")
</pallas_src>

<mosaic_0001>
module attributes {stable_mosaic.version = 11 : i64} {
  func.func @meanasl_kernel(%arg0: i32, %arg1: memref<1x512x80xbf16, #tpu.memory_space<vmem>>, %arg2: memref<80x128xbf16, #tpu.memory_space<vmem>>, %arg3: memref<1x128xf32, #tpu.memory_space<vmem>>, %arg4: memref<128x2xbf16, #tpu.memory_space<vmem>>, %arg5: memref<1x2xf32, #tpu.memory_space<vmem>>, %arg6: memref<512x2xf32, #tpu.memory_space<vmem>>, %arg7: memref<512x2xf32, #tpu.memory_space<vmem>>) attributes {dimension_semantics = [#tpu.dimension_semantics<parallel>], iteration_bounds = array<i64: 2>, scalar_prefetch = 0 : i64, scratch_operands = 0 : i64, tpu.core_type = #tpu.core_type<tc>, window_params = [{transform_indices = @transform_0, window_bounds = array<i64: 1, 512, 80>}, {pipeline_mode = #tpu.pipeline_mode<synchronous>, transform_indices = @transform_1, window_bounds = array<i64: 80, 128>}, {pipeline_mode = #tpu.pipeline_mode<synchronous>, transform_indices = @transform_2, window_bounds = array<i64: 1, 128>}, {pipeline_mode = #tpu.pipeline_mode<synchronous>, transform_indices = @transform_3, window_bounds = array<i64: 128, 2>}, {pipeline_mode = #tpu.pipeline_mode<synchronous>, transform_indices = @transform_4, window_bounds = array<i64: 1, 2>}, {transform_indices = @transform_5, window_bounds = array<i64: 512, 2>}, {transform_indices = @transform_6, window_bounds = array<i64: 512, 2>}]} {
    %c0 = arith.constant 0 : index
    %c0_0 = arith.constant 0 : index
    %c0_1 = arith.constant 0 : index
    %0 = vector.load %arg1[%c0, %c0_0, %c0_1] : memref<1x512x80xbf16, #tpu.memory_space<vmem>>, vector<1x512x80xbf16>
    %1 = vector.shape_cast %0 : vector<1x512x80xbf16> to vector<512x80xbf16>
    %c0_2 = arith.constant 0 : index
    %c0_3 = arith.constant 0 : index
    %2 = vector.load %arg2[%c0_2, %c0_3] : memref<80x128xbf16, #tpu.memory_space<vmem>>, vector<80x128xbf16>
    %cst = arith.constant dense<0.000000e+00> : vector<512x128xf32>
    %3 = tpu.matmul %1, %2, %cst {dimension_numbers = #tpu.dot_dimension_numbers<[1], [0], [0], [1], [0, 0, 1, 1], [], []>} : vector<512x80xbf16>, vector<80x128xbf16>, vector<512x128xf32> -> vector<512x128xf32>
    %4 = vector.extract_strided_slice %3 {offsets = [0, 0], sizes = [512, 2], strides = [1, 1]} : vector<512x128xf32> to vector<512x2xf32>
    %c0_4 = arith.constant 0 : index
    %c0_5 = arith.constant 0 : index
    %5 = vector.load %arg7[%c0_4, %c0_5] : memref<512x2xf32, #tpu.memory_space<vmem>>, vector<512x2xf32>
    tpu.vector_store %arg7[%c0_4, %c0_5], %4 {strides = array<i32>} : memref<512x2xf32, #tpu.memory_space<vmem>>, vector<512x2xf32>,
    %c0_6 = arith.constant 0 : index
    %c0_7 = arith.constant 0 : index
    %6 = vector.load %arg3[%c0_6, %c0_7] : memref<1x128xf32, #tpu.memory_space<vmem>>, vector<1x128xf32>
    %7 = vector.broadcast %6 : vector<1x128xf32> to vector<512x128xf32>
    %8 = arith.addf %3, %7 : vector<512x128xf32>
    %cst_8 = arith.constant 0.000000e+00 : f32
    %9 = vector.broadcast %cst_8 : f32 to vector<512x128xf32>
    %10 = arith.maximumf %8, %9 : vector<512x128xf32>
    %11 = arith.truncf %10 : vector<512x128xf32> to vector<512x128xbf16>
    %c0_9 = arith.constant 0 : index
    %c0_10 = arith.constant 0 : index
    %12 = vector.load %arg4[%c0_9, %c0_10] : memref<128x2xbf16, #tpu.memory_space<vmem>>, vector<128x2xbf16>
    %cst_11 = arith.constant dense<0.000000e+00> : vector<512x2xf32>
    %13 = tpu.matmul %11, %12, %cst_11 {dimension_numbers = #tpu.dot_dimension_numbers<[1], [0], [0], [1], [0, 0, 1, 1], [], []>} : vector<512x128xbf16>, vector<128x2xbf16>, vector<512x2xf32> -> vector<512x2xf32>
    %c0_12 = arith.constant 0 : index
    %c0_13 = arith.constant 0 : index
    %14 = vector.load %arg5[%c0_12, %c0_13] : memref<1x2xf32, #tpu.memory_space<vmem>>, vector<1x2xf32>
    %15 = vector.broadcast %14 : vector<1x2xf32> to vector<512x2xf32>
    %16 = arith.addf %13, %15 : vector<512x2xf32>
    %c0_14 = arith.constant 0 : index
    %c0_15 = arith.constant 0 : index
    %17 = vector.load %arg6[%c0_14, %c0_15] : memref<512x2xf32, #tpu.memory_space<vmem>>, vector<512x2xf32>
    tpu.vector_store %arg6[%c0_14, %c0_15], %16 {strides = array<i32>} : memref<512x2xf32, #tpu.memory_space<vmem>>, vector<512x2xf32>,
    return
  }
  func.func @transform_0(%arg0: i32) -> (i32, i32, i32) {
    %c0_i32 = arith.constant 0 : i32
    %c0_i32_0 = arith.constant 0 : i32
    %c0_i32_1 = arith.constant 0 : i32
    return %c0_i32, %arg0, %c0_i32_0 : i32, i32, i32
  }
  func.func @transform_1(%arg0: i32) -> (i32, i32) {
    %c0_i32 = arith.constant 0 : i32
    %c0_i32_0 = arith.constant 0 : i32
    %c0_i32_1 = arith.constant 0 : i32
    return %c0_i32, %c0_i32_0 : i32, i32
  }
  func.func @transform_2(%arg0: i32) -> (i32, i32) {
    %c0_i32 = arith.constant 0 : i32
    %c0_i32_0 = arith.constant 0 : i32
    %c0_i32_1 = arith.constant 0 : i32
    return %c0_i32, %c0_i32_0 : i32, i32
  }
  func.func @transform_3(%arg0: i32) -> (i32, i32) {
    %c0_i32 = arith.constant 0 : i32
    %c0_i32_0 = arith.constant 0 : i32
    %c0_i32_1 = arith.constant 0 : i32
    return %c0_i32, %c0_i32_0 : i32, i32
  }
  func.func @transform_4(%arg0: i32) -> (i32, i32) {
    %c0_i32 = arith.constant 0 : i32
    %c0_i32_0 = arith.constant 0 : i32
    %c0_i32_1 = arith.constant 0 : i32
    return %c0_i32, %c0_i32_0 : i32, i32
  }
  func.func @transform_5(%arg0: i32) -> (i32, i32) {
    %c0_i32 = arith.constant 0 : i32
    %c0_i32_0 = arith.constant 0 : i32
    return %arg0, %c0_i32 : i32, i32
  }
  func.func @transform_6(%arg0: i32) -> (i32, i32) {
    %c0_i32 = arith.constant 0 : i32
    %c0_i32_0 = arith.constant 0 : i32
    return %arg0, %c0_i32 : i32, i32
  }
}

</mosaic_0001>

<bundles_post_ra>
// kernel: tpu_custom_call.1
= control target key start
LH: loop header
LB: loop body
LE: loop exit
PB: predicated region body
PF: predicated region fallthrough
CT: control target
= control target key end

     0   :  { %s2085_s21 = smov 0   ;;  %s2616_s0 = inlined_call_operand.vmem [shape: bf16[4,1024,80], index: 0, kind: input, shape index: {}]   ;;  %s2617_s1 = inlined_call_operand.vmem [shape: bf16[80,128], index: 1, kind: input, shape index: {}]   ;;  %s2618_s2 = inlined_call_operand.vmem [shape: f32[1,128], index: 2, kind: input, shape index: {}]   ;;  %s2619_s3 = inlined_call_operand.vmem [shape: bf16[128,2], index: 3, kind: input, shape index: {}]   ;;  %s2620_s4 = inlined_call_operand.vmem [shape: f32[1,2], index: 4, kind: input, shape index: {}]   ;;  %s2621_s5 = inlined_call_operand.vmem [shape: f32[1024,2], index: 5, kind: output, shape index: {0}]   ;;  %s2622_s6 = inlined_call_operand.vmem [shape: f32[1024,2], index: 6, kind: output, shape index: {1}]  }
   0x1 LB: > { %s1666_s22 = sadd.s32 4294967295, %s2048_s21   ;;  %p1670_p0 = scmp.ge.s32.totalorder %s2048_s21, 1  ;;  %s2048_s21 = sphi %s2085_s21, %s17_s21  }
   0x2   : > { %p216_p1 = scmp.lt.s32.totalorder %s2048_s21, 3 }
   0x4   : > { %p217_p2 = pnand %p1670_p0, %p216_p1 }
   0x5   : > { %v1997_v0 = vld [vmem:[%s2617_s1] sm:$0xff] (!%p217_p2)   ;;  %s1671_s25 = sshll.u32 (!%p217_p2), %s1666_s22, 6  ;;  %v1998_v1 = vld [vmem:[%s2617_s1 + $0x8] sm:$0xff] (!%p217_p2)   ;;  %v1999_v2 = vld [vmem:[%s2617_s1 + $0x10] sm:$0xff] (!%p217_p2)   ;;  %vm534_vm0 = vcmask (!%p217_p2), 654336   ;;  %vm920_vm1 = vcmask (!%p217_p2), 15360  }
   0x6   : > { %220 = sbr.rel (%p217_p2) target bundleno = 586 (0x24a), region = 40  ;;  %p252_p3 = scmp.lt.s32.totalorder (!%p217_p2), %s1671_s25, 127  ;;  %1835 = vmatprep.subr.bf16.mxu0 (!%p217_p2), %v1997_v0  ;;  %v2000_v4 = vld [vmem:[%s2617_s1 + $0x18] sm:$0xff] (!%p217_p2)   ;;  %v2001_v5 = vld [vmem:[%s2617_s1 + $0x20] sm:$0xff] (!%p217_p2)   ;;  %v2035_v13 = vld [vmem:[%s2619_s3 + $0x8] sm:$0xff] (!%p217_p2)  }
   0x7   : > { %1836 = vmatpush3.bf16.msra.mxu0 (!%p217_p2), %v1997_v0  ;;  %v2034_v12 = vld [vmem:[%s2619_s3] sm:$0xff] (!%p217_p2)   ;;  %v2036_v16 = vld [vmem:[%s2619_s3 + $0x10] sm:$0xff] (!%p217_p2)   ;;  %v2037_v17 = vld [vmem:[%s2619_s3 + $0x18] sm:$0xff] (!%p217_p2)  }
   0x8   : > { %1837 = vmatprep.subr.bf16.mxu0 (!%p217_p2), %v1998_v1  ;;  %1909 = vmatprep.subr.bf16.mxu1 (!%p217_p2), %v2034_v12  ;;  %v2038_v20 = vld [vmem:[%s2619_s3 + $0x20] sm:$0xff] (!%p217_p2)   ;;  %v2039_v21 = vld [vmem:[%s2619_s3 + $0x28] sm:$0xff] (!%p217_p2)   ;;  %v2040_v35 = vld [vmem:[%s2619_s3 + $0x30] sm:$0xff] (!%p217_p2)  }
   0x9   : > { %1910 = vmatpush3.bf16.msra.mxu1 (!%p217_p2), %v2034_v12  ;;  %v2041_v37 = vld [vmem:[%s2619_s3 + $0x38] sm:$0xff] (!%p217_p2)   ;;  %v2215_v45 = vld [vmem:[%s2618_s2] ss:$0 sm:$0xff] (!%p217_p2) }
   0xa   : > { %1911 = vmatprep.subr.bf16.mxu1 (!%p217_p2), %v2035_v13 }
   0xb   : > { %1838 = vmatpush3.bf16.msra.mxu0 (!%p217_p2), %v1998_v1 }
   0xc   : > { %1839 = vmatprep.subr.bf16.mxu0 (!%p217_p2), %v1999_v2 }
   0xd   : > { %s2624_s25 = smov (!%p252_p3, %s1671_s25), 127  ;;  %1912 = vmatpush3.bf16.msra.mxu1 %v2035_v13 }
   0xe   : > { %s1672_s30 = sshll.u32 %s2624_s25, 2  ;;  %1913 = vmatprep.subr.bf16.mxu1 %v2036_v16  ;;  %s1674_s8 = sshll.u32 %s2624_s25, 3 }
   0xf   : > { %s2108_s9 = scalar_lea.vmem %s2616_s0, %s1672_s30  ;;  %1840 = vmatpush3.bf16.msra.mxu0 %v1999_v2  ;;  %s2210_s12 = scalar_lea.vmem %s2622_s6, %s1674_s8 }
  0x10   : > { %v2002_v3 = vld [vmem:[%s2108_s9] sm:$0xff]   ;;  %1841 = vmatprep.subr.bf16.mxu0 %v2000_v4  ;;  %v2003_v6 = vld [vmem:[%s2108_s9 + $0x8] sm:$0xff]   ;;  %v2004_v7 = vld [vmem:[%s2108_s9 + $0x10] sm:$0xff]   ;;  %s2419_s18 = scalar_lea.vmem %s2621_s5, %s1674_s8 }
  0x11   : > { %1845 = vmatprep.mubr.msk.bf16.mxu0 %vm534_vm0, %v2002_v3  ;;  %v2005_v8 = vld [vmem:[%s2108_s9 + $0x18] sm:$0xff]   ;;  %v2006_v9 = vld [vmem:[%s2108_s9 + $0x20] sm:$0xff]   ;;  %v2007_v10 = vld [vmem:[%s2108_s9 + $0x28] sm:$0xff]   ;;  %1914 = vmatpush3.bf16.msra.mxu1 %v2036_v16 }
  0x12   : > { %v2008_v11 = vld [vmem:[%s2108_s9 + $0x30] sm:$0xff]   ;;  %v2009_v14 = vld [vmem:[%s2108_s9 + $0x38] sm:$0xff]   ;;  %v2010_v15 = vld [vmem:[%s2108_s9 + $0x40] sm:$0xff]   ;;  %1915 = vmatprep.subr.bf16.mxu1 %v2037_v17 }
  0x13   : > { %1842 = vmatpush3.bf16.msra.mxu0 %v2000_v4  ;;  %v2011_v18 = vld [vmem:[%s2108_s9 + $0x48] sm:$0xff]   ;;  %v2012_v19 = vld [vmem:[%s2108_s9 + $0x50] sm:$0xff]   ;;  %v2013_v22 = vld [vmem:[%s2108_s9 + $0x58] sm:$0xff]  }
  0x14   : > { %1843 = vmatprep.subr.bf16.mxu0 %v2001_v5  ;;  %v2014_v23 = vld [vmem:[%s2108_s9 + $0x60] sm:$0xff]   ;;  %v2015_v24 = vld [vmem:[%s2108_s9 + $0x68] sm:$0xff]   ;;  %v2016_v25 = vld [vmem:[%s2108_s9 + $0x70] sm:$0xff]  }
  0x15   : > { %1916 = vmatpush3.bf16.msra.mxu1 %v2037_v17  ;;  %v2017_v26 = vld [vmem:[%s2108_s9 + $0x78] sm:$0xff]   ;;  %v2018_v27 = vld [vmem:[%s2108_s9 + $0x80] sm:$0xff]   ;;  %v2019_v28 = vld [vmem:[%s2108_s9 + $0x88] sm:$0xff]  }
  0x16   : > { %1917 = vmatprep.subr.bf16.mxu1 %v2038_v20  ;;  %v2020_v29 = vld [vmem:[%s2108_s9 + $0x90] sm:$0xff]   ;;  %v2021_v30 = vld [vmem:[%s2108_s9 + $0x98] sm:$0xff]   ;;  %v2022_v31 = vld [vmem:[%s2108_s9 + $0xa0] sm:$0xff]  }
  0x17   : > { %1844 = vmatpush3.bf16.msra.mxu0 %v2001_v5  ;;  %v2023_v32 = vld [vmem:[%s2108_s9 + $0xa8] sm:$0xff]   ;;  %v2024_v33 = vld [vmem:[%s2108_s9 + $0xb0] sm:$0xff]   ;;  %v2025_v34 = vld [vmem:[%s2108_s9 + $0xb8] sm:$0xff]  }
  0x18   : > { %v2026_v36 = vld [vmem:[%s2108_s9 + $0xc0] sm:$0xff]   ;;  %v2027_v38 = vld [vmem:[%s2108_s9 + $0xc8] sm:$0xff]   ;;  %v2028_v39 = vld [vmem:[%s2108_s9 + $0xd0] sm:$0xff]  }
  0x19   : > { %1918 = vmatpush3.bf16.msra.mxu1 %v2038_v20  ;;  %v2029_v40 = vld [vmem:[%s2108_s9 + $0xd8] sm:$0xff]   ;;  %v2030_v41 = vld [vmem:[%s2108_s9 + $0xe0] sm:$0xff]   ;;  %v2031_v42 = vld [vmem:[%s2108_s9 + $0xe8] sm:$0xff]  }
  0x1a   : > { %1846 = vmatmul.mubr.msk.bf16.vlgmr.msra.gmra.mrb[0].mxu0 %vm534_vm0, %v2003_v6  ;;  %1919 = vmatprep.subr.bf16.mxu1 %v2039_v21  ;;  %v2032_v43 = vld [vmem:[%s2108_s9 + $0xf0] sm:$0xff]   ;;  %v2033_v44 = vld [vmem:[%s2108_s9 + $0xf8] sm:$0xff]  }
  0x1b   : > { %1849 = vmatprep.mubr.msk.bf16.mxu0 %vm534_vm0, %v2004_v7 }
  0x1d   : > { %1920 = vmatpush3.bf16.msra.mxu1 %v2039_v21 }
  0x1e   : > { %1921 = vmatprep.subr.bf16.mxu1 %v2040_v35 }
  0x21   : > { %1922 = vmatpush3.bf16.msra.mxu1 %v2040_v35 }
  0x22   : > { %1850 = vmatmul.mubr.msk.bf16.gmra.mrb[4].mxu0 %vm534_vm0, %v2005_v8  ;;  %1923 = vmatprep.subr.bf16.mxu1 %v2041_v37 }
  0x23   : > { %1853 = vmatprep.mubr.msk.bf16.mxu0 %vm534_vm0, %v2006_v9 }
  0x25   : > { %1924 = vmatpush3.bf16.msra.mxu1 %v2041_v37 }
  0x2a   : > { %1854 = vmatmul.mubr.msk.bf16.gmra.mrb[8].mxu0 %vm534_vm0, %v2007_v10 }
  0x2b   : > { %1857 = vmatprep.mubr.msk.bf16.mxu0 %vm534_vm0, %v2008_v11 }
  0x32   : > { %1858 = vmatmul.mubr.msk.bf16.gmra.mrb[12].mxu0 %vm534_vm0, %v2009_v14 }
  0x33   : > { %1861 = vmatprep.mubr.msk.bf16.mxu0 %vm534_vm0, %v2010_v15 }
  0x3a   : > { %1862 = vmatmul.mubr.msk.bf16.gmra.mrb[16].mxu0 %vm534_vm0, %v2011_v18 }
  0x3b   : > { %1865 = vmatprep.mubr.msk.bf16.mxu0 %vm534_vm0, %v2012_v19 }
  0x42   : > { %1866 = vmatmul.mubr.msk.bf16.gmra.mrb[20].mxu0 %vm534_vm0, %v2013_v22 }
  0x43   : > { %1869 = vmatprep.mubr.msk.bf16.mxu0 %vm534_vm0, %v2014_v23 }
  0x4a   : > { %1870 = vmatmul.mubr.msk.bf16.gmra.mrb[24].mxu0 %vm534_vm0, %v2015_v24 }
  0x4b   : > { %1873 = vmatprep.mubr.msk.bf16.mxu0 %vm534_vm0, %v2016_v25 }
  0x52   : > { %1874 = vmatmul.mubr.msk.bf16.gmra.mrb[28].mxu0 %vm534_vm0, %v2017_v26 }
  0x53   : > { %1877 = vmatprep.mubr.msk.bf16.mxu0 %vm534_vm0, %v2018_v27 }
  0x5a   : > { %1878 = vmatmul.mubr.msk.bf16.gmra.mrb[32].mxu0 %vm534_vm0, %v2019_v28 }
  0x5b   : > { %1881 = vmatprep.mubr.msk.bf16.mxu0 %vm534_vm0, %v2020_v29 }
  0x62   : > { %1882 = vmatmul.mubr.msk.bf16.gmra.mrb[36].mxu0 %vm534_vm0, %v2021_v30 }
  0x63   : > { %1885 = vmatprep.mubr.msk.bf16.mxu0 %vm534_vm0, %v2022_v31 }
  0x6a   : > { %1886 = vmatmul.mubr.msk.bf16.gmra.mrb[40].mxu0 %vm534_vm0, %v2023_v32 }
  0x6b   : > { %1889 = vmatprep.mubr.msk.bf16.mxu0 %vm534_vm0, %v2024_v33 }
  0x72   : > { %1890 = vmatmul.mubr.msk.bf16.gmra.mrb[44].mxu0 %vm534_vm0, %v2025_v34 }
  0x73   : > { %1893 = vmatprep.mubr.msk.bf16.mxu0 %vm534_vm0, %v2026_v36 }
  0x7a   : > { %1894 = vmatmul.mubr.msk.bf16.gmra.mrb[48].mxu0 %vm534_vm0, %v2027_v38 }
  0x7b   : > { %1897 = vmatprep.mubr.msk.bf16.mxu0 %vm534_vm0, %v2028_v39 }
  0x82   : > { %1898 = vmatmul.mubr.msk.bf16.gmra.mrb[52].mxu0 %vm534_vm0, %v2029_v40 }
  0x83   : > { %1901 = vmatprep.mubr.msk.bf16.mxu0 %vm534_vm0, %v2030_v41 }
  0x8a   : > { %1902 = vmatmul.mubr.msk.bf16.gmra.mrb[56].mxu0 %vm534_vm0, %v2031_v42 }
  0x8b   : > { %1905 = vmatprep.mubr.msk.bf16.mxu0 %vm534_vm0, %v2032_v43 }
  0x92   : > { %1906 = vmatmul.mubr.msk.bf16.gmra.mrb[60].mxu0 %vm534_vm0, %v2033_v44 }
  0xed   : > { %v1847_v46 = vpop.f32.mrb[0].mxu0 }
  0xee   : > { %923 = vst.msk [vmem:[%s2210_s12 + $0x10] sm:$0xff] %vm920_vm1, %v1847_v46  ;;  %v994_v47 = vadd.f32 %v1847_v46, %v2215_v45  ;;  %v665_v48 = vpop.f32.mrb[1].mxu0 }
  0xef   : > { %921 = vst.msk [vmem:[%s2210_s12] sm:$0xff] %vm920_vm1, %v665_v48  ;;  %v992_v49 = vadd.f32 %v2215_v45, %v665_v48  ;;  %v1848_v50 = vpop.f32.mrb[2].mxu0 }
  0xf0   : > { %924 = vst.msk [vmem:[%s2210_s12 + $0x18] sm:$0xff] %vm920_vm1, %v1848_v50  ;;  %v995_v51 = vadd.f32 %v1848_v50, %v2215_v45  ;;  %v668_v52 = vpop.f32.mrb[3].mxu0  ;;  %v1058_v54 = vmax.f32 %v994_v47, 0.0 }
  0xf1   : > { %922 = vst.msk [vmem:[%s2210_s12 + $0x8] sm:$0xff] %vm920_vm1, %v668_v52  ;;  %v993_v53 = vadd.f32 %v2215_v45, %v668_v52  ;;  %v1056_v56 = vmax.f32 %v992_v49, 0.0 }
  0xf2   : > { %v1059_v55 = vmax.f32 %v995_v51, 0.0 }
  0xf3   : > { %v1057_v57 = vmax.f32 %v993_v53, 0.0 }
  0xf4   : > { %v1121_v58 = vpack.c.bf16 %v1059_v55, %v1058_v54 }
  0xf5   : > { %v1851_v59 = vpop.f32.mrb[4].mxu0  ;;  %v1120_v60 = vpack.c.bf16 %v1057_v57, %v1056_v56 }
  0xf6   : > { %927 = vst.msk [vmem:[%s2210_s12 + $0x30] sm:$0xff] %vm920_vm1, %v1851_v59  ;;  %v998_v61 = vadd.f32 %v1851_v59, %v2215_v45  ;;  %v681_v62 = vpop.f32.mrb[5].mxu0 }
  0xf7   : > { %925 = vst.msk [vmem:[%s2210_s12 + $0x20] sm:$0xff] %vm920_vm1, %v681_v62  ;;  %v996_v63 = vadd.f32 %v2215_v45, %v681_v62  ;;  %v1852_v0 = vpop.f32.mrb[6].mxu0  ;;  %1925 = vmatprep.mubr.bf16.mxu1 %v1120_v60 }
  0xf8   : > { %928 = vst.msk [vmem:[%s2210_s12 + $0x38] sm:$0xff] %vm920_vm1, %v1852_v0  ;;  %v999_v1 = vadd.f32 %v1852_v0, %v2215_v45  ;;  %v684_v2 = vpop.f32.mrb[7].mxu0  ;;  %1926 = vmatmul.mubr.bf16.vlgmr.msra.gmra.mrb[0].mxu1 %v1121_v58  ;;  %v1062_v4 = vmax.f32 %v998_v61, 0.0 }
  0xf9   : > { %926 = vst.msk [vmem:[%s2210_s12 + $0x28] sm:$0xff] %vm920_vm1, %v684_v2  ;;  %v997_v3 = vadd.f32 %v2215_v45, %v684_v2  ;;  %v1060_v6 = vmax.f32 %v996_v63, 0.0 }
  0xfa   : > { %v1063_v5 = vmax.f32 %v999_v1, 0.0 }
  0xfb   : > { %v1061_v7 = vmax.f32 %v997_v3, 0.0 }
  0xfc   : > { %v1123_v8 = vpack.c.bf16 %v1063_v5, %v1062_v4 }
  0xfd   : > { %v1855_v9 = vpop.f32.mrb[8].mxu0  ;;  %v1122_v10 = vpack.c.bf16 %v1061_v7, %v1060_v6 }
  0xfe   : > { %931 = vst.msk [vmem:[%s2210_s12 + $0x50] sm:$0xff] %vm920_vm1, %v1855_v9  ;;  %v1002_v11 = vadd.f32 %v1855_v9, %v2215_v45  ;;  %v697_v12 = vpop.f32.mrb[9].mxu0 }
  0xff   : > { %929 = vst.msk [vmem:[%s2210_s12 + $0x40] sm:$0xff] %vm920_vm1, %v697_v12  ;;  %v1000_v13 = vadd.f32 %v2215_v45, %v697_v12  ;;  %v1856_v14 = vpop.f32.mrb[10].mxu0  ;;  %1929 = vmatprep.mubr.bf16.mxu1 %v1122_v10 }
 0x100   : > { %932 = vst.msk [vmem:[%s2210_s12 + $0x58] sm:$0xff] %vm920_vm1, %v1856_v14  ;;  %v1003_v15 = vadd.f32 %v1856_v14, %v2215_v45  ;;  %v700_v16 = vpop.f32.mrb[11].mxu0  ;;  %1930 = vmatmul.mubr.bf16.gmra.mrb[4].mxu1 %v1123_v8  ;;  %v1066_v18 = vmax.f32 %v1002_v11, 0.0 }
 0x101   : > { %930 = vst.msk [vmem:[%s2210_s12 + $0x48] sm:$0xff] %vm920_vm1, %v700_v16  ;;  %v1001_v17 = vadd.f32 %v2215_v45, %v700_v16  ;;  %v1064_v20 = vmax.f32 %v1000_v13, 0.0 }
 0x102   : > { %v1067_v19 = vmax.f32 %v1003_v15, 0.0 }
 0x103   : > { %v1065_v21 = vmax.f32 %v1001_v17, 0.0 }
 0x104   : > { %v1125_v22 = vpack.c.bf16 %v1067_v19, %v1066_v18 }
 0x105   : > { %v1859_v23 = vpop.f32.mrb[12].mxu0  ;;  %v1124_v24 = vpack.c.bf16 %v1065_v21, %v1064_v20 }
 0x106   : > { %935 = vst.msk [vmem:[%s2210_s12 + $0x70] sm:$0xff] %vm920_vm1, %v1859_v23  ;;  %v1006_v25 = vadd.f32 %v1859_v23, %v2215_v45  ;;  %v713_v26 = vpop.f32.mrb[13].mxu0 }
 0x107   : > { %933 = vst.msk [vmem:[%s2210_s12 + $0x60] sm:$0xff] %vm920_vm1, %v713_v26  ;;  %v1004_v27 = vadd.f32 %v2215_v45, %v713_v26  ;;  %v1860_v28 = vpop.f32.mrb[14].mxu0  ;;  %1933 = vmatprep.mubr.bf16.mxu1 %v1124_v24 }
 0x108   : > { %936 = vst.msk [vmem:[%s2210_s12 + $0x78] sm:$0xff] %vm920_vm1, %v1860_v28  ;;  %v1007_v29 = vadd.f32 %v1860_v28, %v2215_v45  ;;  %v716_v30 = vpop.f32.mrb[15].mxu0  ;;  %1934 = vmatmul.mubr.bf16.gmra.mrb[8].mxu1 %v1125_v22  ;;  %v1070_v32 = vmax.f32 %v1006_v25, 0.0 }
 0x109   : > { %934 = vst.msk [vmem:[%s2210_s12 + $0x68] sm:$0xff] %vm920_vm1, %v716_v30  ;;  %v1005_v31 = vadd.f32 %v2215_v45, %v716_v30  ;;  %v1068_v34 = vmax.f32 %v1004_v27, 0.0 }
 0x10a   : > { %v1071_v33 = vmax.f32 %v1007_v29, 0.0 }
 0x10b   : > { %v1069_v35 = vmax.f32 %v1005_v31, 0.0 }
 0x10c   : > { %v1127_v36 = vpack.c.bf16 %v1071_v33, %v1070_v32 }
 0x10d   : > { %v1863_v37 = vpop.f32.mrb[16].mxu0  ;;  %v1126_v38 = vpack.c.bf16 %v1069_v35, %v1068_v34 }
 0x10e   : > { %939 = vst.msk [vmem:[%s2210_s12 + $0x90] sm:$0xff] %vm920_vm1, %v1863_v37  ;;  %v1010_v39 = vadd.f32 %v1863_v37, %v2215_v45  ;;  %v729_v40 = vpop.f32.mrb[17].mxu0 }
 0x10f   : > { %937 = vst.msk [vmem:[%s2210_s12 + $0x80] sm:$0xff] %vm920_vm1, %v729_v40  ;;  %v1008_v41 = vadd.f32 %v2215_v45, %v729_v40  ;;  %v1864_v42 = vpop.f32.mrb[18].mxu0  ;;  %1937 = vmatprep.mubr.bf16.mxu1 %v1126_v38 }
 0x110   : > { %940 = vst.msk [vmem:[%s2210_s12 + $0x98] sm:$0xff] %vm920_vm1, %v1864_v42  ;;  %v1011_v43 = vadd.f32 %v1864_v42, %v2215_v45  ;;  %v732_v44 = vpop.f32.mrb[19].mxu0  ;;  %1938 = vmatmul.mubr.bf16.gmra.mrb[12].mxu1 %v1127_v36  ;;  %v1074_v47 = vmax.f32 %v1010_v39, 0.0 }
 0x111   : > { %938 = vst.msk [vmem:[%s2210_s12 + $0x88] sm:$0xff] %vm920_vm1, %v732_v44  ;;  %v1009_v46 = vadd.f32 %v2215_v45, %v732_v44  ;;  %v1072_v49 = vmax.f32 %v1008_v41, 0.0 }
 0x112   : > { %v1075_v48 = vmax.f32 %v1011_v43, 0.0 }
 0x113   : > { %v1073_v50 = vmax.f32 %v1009_v46, 0.0 }
 0x114   : > { %v1129_v51 = vpack.c.bf16 %v1075_v48, %v1074_v47 }
 0x115   : > { %v1867_v52 = vpop.f32.mrb[20].mxu0  ;;  %v1128_v53 = vpack.c.bf16 %v1073_v50, %v1072_v49 }
 0x116   : > { %943 = vst.msk [vmem:[%s2210_s12 + $0xb0] sm:$0xff] %vm920_vm1, %v1867_v52  ;;  %v1014_v54 = vadd.f32 %v1867_v52, %v2215_v45  ;;  %v745_v55 = vpop.f32.mrb[21].mxu0 }
 0x117   : > { %941 = vst.msk [vmem:[%s2210_s12 + $0xa0] sm:$0xff] %vm920_vm1, %v745_v55  ;;  %v1012_v56 = vadd.f32 %v2215_v45, %v745_v55  ;;  %v1868_v57 = vpop.f32.mrb[22].mxu0  ;;  %1941 = vmatprep.mubr.bf16.mxu1 %v1128_v53 }
 0x118   : > { %944 = vst.msk [vmem:[%s2210_s12 + $0xb8] sm:$0xff] %vm920_vm1, %v1868_v57  ;;  %v1015_v58 = vadd.f32 %v1868_v57, %v2215_v45  ;;  %v748_v59 = vpop.f32.mrb[23].mxu0  ;;  %1942 = vmatmul.mubr.bf16.gmra.mrb[16].mxu1 %v1129_v51  ;;  %v1078_v61 = vmax.f32 %v1014_v54, 0.0 }
 0x119   : > { %942 = vst.msk [vmem:[%s2210_s12 + $0xa8] sm:$0xff] %vm920_vm1, %v748_v59  ;;  %v1013_v60 = vadd.f32 %v2215_v45, %v748_v59  ;;  %v1076_v63 = vmax.f32 %v1012_v56, 0.0 }
 0x11a   : > { %v1079_v62 = vmax.f32 %v1015_v58, 0.0 }
 0x11b   : > { %v1077_v0 = vmax.f32 %v1013_v60, 0.0 }
 0x11c   : > { %v1131_v1 = vpack.c.bf16 %v1079_v62, %v1078_v61 }
 0x11d   : > { %v1871_v2 = vpop.f32.mrb[24].mxu0  ;;  %v1130_v3 = vpack.c.bf16 %v1077_v0, %v1076_v63 }
 0x11e   : > { %947 = vst.msk [vmem:[%s2210_s12 + $0xd0] sm:$0xff] %vm920_vm1, %v1871_v2  ;;  %v1018_v4 = vadd.f32 %v1871_v2, %v2215_v45  ;;  %v761_v5 = vpop.f32.mrb[25].mxu0 }
 0x11f   : > { %945 = vst.msk [vmem:[%s2210_s12 + $0xc0] sm:$0xff] %vm920_vm1, %v761_v5  ;;  %v1016_v6 = vadd.f32 %v2215_v45, %v761_v5  ;;  %v1872_v7 = vpop.f32.mrb[26].mxu0  ;;  %1945 = vmatprep.mubr.bf16.mxu1 %v1130_v3 }
 0x120   : > { %948 = vst.msk [vmem:[%s2210_s12 + $0xd8] sm:$0xff] %vm920_vm1, %v1872_v7  ;;  %v1019_v8 = vadd.f32 %v1872_v7, %v2215_v45  ;;  %v764_v9 = vpop.f32.mrb[27].mxu0  ;;  %1946 = vmatmul.mubr.bf16.gmra.mrb[20].mxu1 %v1131_v1  ;;  %v1082_v11 = vmax.f32 %v1018_v4, 0.0 }
 0x121   : > { %946 = vst.msk [vmem:[%s2210_s12 + $0xc8] sm:$0xff] %vm920_vm1, %v764_v9  ;;  %v1017_v10 = vadd.f32 %v2215_v45, %v764_v9  ;;  %v1080_v13 = vmax.f32 %v1016_v6, 0.0 }
 0x122   : > { %v1083_v12 = vmax.f32 %v1019_v8, 0.0 }
 0x123   : > { %v1081_v14 = vmax.f32 %v1017_v10, 0.0 }
 0x124   : > { %v1133_v15 = vpack.c.bf16 %v1083_v12, %v1082_v11 }
 0x125   : > { %v1875_v16 = vpop.f32.mrb[28].mxu0  ;;  %v1132_v17 = vpack.c.bf16 %v1081_v14, %v1080_v13 }
 0x126   : > { %951 = vst.msk [vmem:[%s2210_s12 + $0xf0] sm:$0xff] %vm920_vm1, %v1875_v16  ;;  %v1022_v18 = vadd.f32 %v1875_v16, %v2215_v45  ;;  %v777_v19 = vpop.f32.mrb[29].mxu0 }
 0x127   : > { %949 = vst.msk [vmem:[%s2210_s12 + $0xe0] sm:$0xff] %vm920_vm1, %v777_v19  ;;  %v1020_v20 = vadd.f32 %v2215_v45, %v777_v19  ;;  %v1876_v21 = vpop.f32.mrb[30].mxu0  ;;  %1949 = vmatprep.mubr.bf16.mxu1 %v1132_v17 }
 0x128   : > { %952 = vst.msk [vmem:[%s2210_s12 + $0xf8] sm:$0xff] %vm920_vm1, %v1876_v21  ;;  %v1023_v22 = vadd.f32 %v1876_v21, %v2215_v45  ;;  %v780_v23 = vpop.f32.mrb[31].mxu0  ;;  %1950 = vmatmul.mubr.bf16.gmra.mrb[24].mxu1 %v1133_v15  ;;  %v1086_v25 = vmax.f32 %v1022_v18, 0.0 }
 0x129   : > { %950 = vst.msk [vmem:[%s2210_s12 + $0xe8] sm:$0xff] %vm920_vm1, %v780_v23  ;;  %v1021_v24 = vadd.f32 %v2215_v45, %v780_v23  ;;  %v1084_v27 = vmax.f32 %v1020_v20, 0.0 }
 0x12a   : > { %v1087_v26 = vmax.f32 %v1023_v22, 0.0 }
 0x12b   : > { %v1085_v28 = vmax.f32 %v1021_v24, 0.0 }
 0x12c   : > { %v1135_v29 = vpack.c.bf16 %v1087_v26, %v1086_v25 }
 0x12d   : > { %v1879_v30 = vpop.f32.mrb[32].mxu0  ;;  %v1134_v31 = vpack.c.bf16 %v1085_v28, %v1084_v27 }
 0x12e   : > { %955 = vst.msk [vmem:[%s2210_s12 + $0x110] sm:$0xff] %vm920_vm1, %v1879_v30  ;;  %v1026_v32 = vadd.f32 %v1879_v30, %v2215_v45  ;;  %v793_v33 = vpop.f32.mrb[33].mxu0 }
 0x12f   : > { %953 = vst.msk [vmem:[%s2210_s12 + $0x100] sm:$0xff] %vm920_vm1, %v793_v33  ;;  %v1024_v34 = vadd.f32 %v2215_v45, %v793_v33  ;;  %v1880_v35 = vpop.f32.mrb[34].mxu0  ;;  %1953 = vmatprep.mubr.bf16.mxu1 %v1134_v31 }
 0x130   : > { %956 = vst.msk [vmem:[%s2210_s12 + $0x118] sm:$0xff] %vm920_vm1, %v1880_v35  ;;  %v1027_v36 = vadd.f32 %v1880_v35, %v2215_v45  ;;  %v796_v37 = vpop.f32.mrb[35].mxu0  ;;  %1954 = vmatmul.mubr.bf16.gmra.mrb[28].mxu1 %v1135_v29  ;;  %v1090_v39 = vmax.f32 %v1026_v32, 0.0 }
 0x131   : > { %954 = vst.msk [vmem:[%s2210_s12 + $0x108] sm:$0xff] %vm920_vm1, %v796_v37  ;;  %v1025_v38 = vadd.f32 %v2215_v45, %v796_v37  ;;  %v1088_v41 = vmax.f32 %v1024_v34, 0.0 }
 0x132   : > { %v1091_v40 = vmax.f32 %v1027_v36, 0.0 }
 0x133   : > { %v1089_v42 = vmax.f32 %v1025_v38, 0.0 }
 0x134   : > { %v1137_v43 = vpack.c.bf16 %v1091_v40, %v1090_v39 }
 0x135   : > { %v1883_v44 = vpop.f32.mrb[36].mxu0  ;;  %v1136_v46 = vpack.c.bf16 %v1089_v42, %v1088_v41 }
 0x136   : > { %959 = vst.msk [vmem:[%s2210_s12 + $0x130] sm:$0xff] %vm920_vm1, %v1883_v44  ;;  %v1030_v47 = vadd.f32 %v1883_v44, %v2215_v45  ;;  %v809_v48 = vpop.f32.mrb[37].mxu0 }
 0x137   : > { %957 = vst.msk [vmem:[%s2210_s12 + $0x120] sm:$0xff] %vm920_vm1, %v809_v48  ;;  %v1028_v49 = vadd.f32 %v2215_v45, %v809_v48  ;;  %v1884_v50 = vpop.f32.mrb[38].mxu0  ;;  %1957 = vmatprep.mubr.bf16.mxu1 %v1136_v46 }
 0x138   : > { %960 = vst.msk [vmem:[%s2210_s12 + $0x138] sm:$0xff] %vm920_vm1, %v1884_v50  ;;  %v1031_v51 = vadd.f32 %v1884_v50, %v2215_v45  ;;  %v812_v52 = vpop.f32.mrb[39].mxu0  ;;  %1958 = vmatmul.mubr.bf16.gmra.mrb[32].mxu1 %v1137_v43  ;;  %v1094_v54 = vmax.f32 %v1030_v47, 0.0 }
 0x139   : > { %958 = vst.msk [vmem:[%s2210_s12 + $0x128] sm:$0xff] %vm920_vm1, %v812_v52  ;;  %v1029_v53 = vadd.f32 %v2215_v45, %v812_v52  ;;  %v1092_v56 = vmax.f32 %v1028_v49, 0.0 }
 0x13a   : > { %v1095_v55 = vmax.f32 %v1031_v51, 0.0 }
 0x13b   : > { %v1093_v57 = vmax.f32 %v1029_v53, 0.0 }
 0x13c   : > { %v1139_v58 = vpack.c.bf16 %v1095_v55, %v1094_v54 }
 0x13d   : > { %v1887_v59 = vpop.f32.mrb[40].mxu0  ;;  %v1138_v60 = vpack.c.bf16 %v1093_v57, %v1092_v56 }
 0x13e   : > { %963 = vst.msk [vmem:[%s2210_s12 + $0x150] sm:$0xff] %vm920_vm1, %v1887_v59  ;;  %v1034_v61 = vadd.f32 %v1887_v59, %v2215_v45  ;;  %v825_v62 = vpop.f32.mrb[41].mxu0 }
 0x13f   : > { %961 = vst.msk [vmem:[%s2210_s12 + $0x140] sm:$0xff] %vm920_vm1, %v825_v62  ;;  %v1032_v63 = vadd.f32 %v2215_v45, %v825_v62  ;;  %v1888_v0 = vpop.f32.mrb[42].mxu0  ;;  %1961 = vmatprep.mubr.bf16.mxu1 %v1138_v60 }
 0x140   : > { %964 = vst.msk [vmem:[%s2210_s12 + $0x158] sm:$0xff] %vm920_vm1, %v1888_v0  ;;  %v1035_v1 = vadd.f32 %v1888_v0, %v2215_v45  ;;  %v828_v2 = vpop.f32.mrb[43].mxu0  ;;  %1962 = vmatmul.mubr.bf16.gmra.mrb[36].mxu1 %v1139_v58  ;;  %v1098_v4 = vmax.f32 %v1034_v61, 0.0 }
 0x141   : > { %962 = vst.msk [vmem:[%s2210_s12 + $0x148] sm:$0xff] %vm920_vm1, %v828_v2  ;;  %v1033_v3 = vadd.f32 %v2215_v45, %v828_v2  ;;  %v1096_v6 = vmax.f32 %v1032_v63, 0.0 }
 0x142   : > { %v1099_v5 = vmax.f32 %v1035_v1, 0.0 }
 0x143   : > { %v1097_v7 = vmax.f32 %v1033_v3, 0.0 }
 0x144   : > { %v1141_v8 = vpack.c.bf16 %v1099_v5, %v1098_v4 }
 0x145   : > { %v1891_v9 = vpop.f32.mrb[44].mxu0  ;;  %v1140_v10 = vpack.c.bf16 %v1097_v7, %v1096_v6 }
 0x146   : > { %967 = vst.msk [vmem:[%s2210_s12 + $0x170] sm:$0xff] %vm920_vm1, %v1891_v9  ;;  %v1038_v11 = vadd.f32 %v1891_v9, %v2215_v45  ;;  %v841_v12 = vpop.f32.mrb[45].mxu0 }
 0x147   : > { %965 = vst.msk [vmem:[%s2210_s12 + $0x160] sm:$0xff] %vm920_vm1, %v841_v12  ;;  %v1036_v13 = vadd.f32 %v2215_v45, %v841_v12  ;;  %v1892_v14 = vpop.f32.mrb[46].mxu0  ;;  %1965 = vmatprep.mubr.bf16.mxu1 %v1140_v10 }
 0x148   : > { %968 = vst.msk [vmem:[%s2210_s12 + $0x178] sm:$0xff] %vm920_vm1, %v1892_v14  ;;  %v1039_v15 = vadd.f32 %v1892_v14, %v2215_v45  ;;  %v844_v16 = vpop.f32.mrb[47].mxu0  ;;  %1966 = vmatmul.mubr.bf16.gmra.mrb[40].mxu1 %v1141_v8  ;;  %v1102_v18 = vmax.f32 %v1038_v11, 0.0 }
 0x149   : > { %966 = vst.msk [vmem:[%s2210_s12 + $0x168] sm:$0xff] %vm920_vm1, %v844_v16  ;;  %v1037_v17 = vadd.f32 %v2215_v45, %v844_v16  ;;  %v1100_v20 = vmax.f32 %v1036_v13, 0.0 }
 0x14a   : > { %v1103_v19 = vmax.f32 %v1039_v15, 0.0 }
 0x14b   : > { %v1101_v21 = vmax.f32 %v1037_v17, 0.0  ;;  %v2412_v17 = vld [vmem:[%s2620_s4] ss:$0 sm:$0xff] }
 0x14c   : > { %v1143_v22 = vpack.c.bf16 %v1103_v19, %v1102_v18 }
 0x14d   : > { %v1895_v23 = vpop.f32.mrb[48].mxu0  ;;  %v1142_v24 = vpack.c.bf16 %v1101_v21, %v1100_v20 }
 0x14e   : > { %971 = vst.msk [vmem:[%s2210_s12 + $0x190] sm:$0xff] %vm920_vm1, %v1895_v23  ;;  %v1042_v25 = vadd.f32 %v1895_v23, %v2215_v45  ;;  %v857_v26 = vpop.f32.mrb[49].mxu0 }
 0x14f   : > { %969 = vst.msk [vmem:[%s2210_s12 + $0x180] sm:$0xff] %vm920_vm1, %v857_v26  ;;  %v1040_v27 = vadd.f32 %v2215_v45, %v857_v26  ;;  %v1896_v28 = vpop.f32.mrb[50].mxu0  ;;  %1969 = vmatprep.mubr.bf16.mxu1 %v1142_v24 }
 0x150   : > { %972 = vst.msk [vmem:[%s2210_s12 + $0x198] sm:$0xff] %vm920_vm1, %v1896_v28  ;;  %v1043_v29 = vadd.f32 %v1896_v28, %v2215_v45  ;;  %v860_v30 = vpop.f32.mrb[51].mxu0  ;;  %1970 = vmatmul.mubr.bf16.gmra.mrb[44].mxu1 %v1143_v22  ;;  %v1106_v32 = vmax.f32 %v1042_v25, 0.0 }
 0x151   : > { %970 = vst.msk [vmem:[%s2210_s12 + $0x188] sm:$0xff] %vm920_vm1, %v860_v30  ;;  %v1041_v31 = vadd.f32 %v2215_v45, %v860_v30  ;;  %v1104_v34 = vmax.f32 %v1040_v27, 0.0 }
 0x152   : > { %v1107_v33 = vmax.f32 %v1043_v29, 0.0 }
 0x153   : > { %v1105_v35 = vmax.f32 %v1041_v31, 0.0 }
 0x154   : > { %v1145_v36 = vpack.c.bf16 %v1107_v33, %v1106_v32 }
 0x155   : > { %v1899_v37 = vpop.f32.mrb[52].mxu0  ;;  %v1144_v38 = vpack.c.bf16 %v1105_v35, %v1104_v34 }
 0x156   : > { %975 = vst.msk [vmem:[%s2210_s12 + $0x1b0] sm:$0xff] %vm920_vm1, %v1899_v37  ;;  %v1046_v39 = vadd.f32 %v1899_v37, %v2215_v45  ;;  %v873_v40 = vpop.f32.mrb[53].mxu0 }
 0x157   : > { %973 = vst.msk [vmem:[%s2210_s12 + $0x1a0] sm:$0xff] %vm920_vm1, %v873_v40  ;;  %v1044_v41 = vadd.f32 %v2215_v45, %v873_v40  ;;  %v1900_v42 = vpop.f32.mrb[54].mxu0  ;;  %1973 = vmatprep.mubr.bf16.mxu1 %v1144_v38 }
 0x158   : > { %976 = vst.msk [vmem:[%s2210_s12 + $0x1b8] sm:$0xff] %vm920_vm1, %v1900_v42  ;;  %v1047_v43 = vadd.f32 %v1900_v42, %v2215_v45  ;;  %v876_v44 = vpop.f32.mrb[55].mxu0  ;;  %1974 = vmatmul.mubr.bf16.gmra.mrb[48].mxu1 %v1145_v36  ;;  %v1110_v47 = vmax.f32 %v1046_v39, 0.0 }
 0x159   : > { %974 = vst.msk [vmem:[%s2210_s12 + $0x1a8] sm:$0xff] %vm920_vm1, %v876_v44  ;;  %v1045_v46 = vadd.f32 %v2215_v45, %v876_v44  ;;  %v1108_v49 = vmax.f32 %v1044_v41, 0.0 }
 0x15a   : > { %v1111_v48 = vmax.f32 %v1047_v43, 0.0 }
 0x15b   : > { %v1109_v50 = vmax.f32 %v1045_v46, 0.0 }
 0x15c   : > { %v1147_v51 = vpack.c.bf16 %v1111_v48, %v1110_v47 }
 0x15d   : > { %v1903_v52 = vpop.f32.mrb[56].mxu0  ;;  %v1146_v53 = vpack.c.bf16 %v1109_v50, %v1108_v49 }
 0x15e   : > { %979 = vst.msk [vmem:[%s2210_s12 + $0x1d0] sm:$0xff] %vm920_vm1, %v1903_v52  ;;  %v1050_v54 = vadd.f32 %v1903_v52, %v2215_v45  ;;  %v889_v55 = vpop.f32.mrb[57].mxu0 }
 0x15f   : > { %977 = vst.msk [vmem:[%s2210_s12 + $0x1c0] sm:$0xff] %vm920_vm1, %v889_v55  ;;  %v1048_v56 = vadd.f32 %v2215_v45, %v889_v55  ;;  %v1904_v57 = vpop.f32.mrb[58].mxu0  ;;  %1977 = vmatprep.mubr.bf16.mxu1 %v1146_v53 }
 0x160   : > { %980 = vst.msk [vmem:[%s2210_s12 + $0x1d8] sm:$0xff] %vm920_vm1, %v1904_v57  ;;  %v1051_v58 = vadd.f32 %v1904_v57, %v2215_v45  ;;  %v892_v59 = vpop.f32.mrb[59].mxu0  ;;  %1978 = vmatmul.mubr.bf16.gmra.mrb[52].mxu1 %v1147_v51  ;;  %v1114_v61 = vmax.f32 %v1050_v54, 0.0 }
 0x161   : > { %978 = vst.msk [vmem:[%s2210_s12 + $0x1c8] sm:$0xff] %vm920_vm1, %v892_v59  ;;  %v1049_v60 = vadd.f32 %v2215_v45, %v892_v59  ;;  %v1112_v63 = vmax.f32 %v1048_v56, 0.0 }
 0x162   : > { %v1115_v62 = vmax.f32 %v1051_v58, 0.0 }
 0x163   : > { %v1113_v0 = vmax.f32 %v1049_v60, 0.0 }
 0x164   : > { %v1149_v1 = vpack.c.bf16 %v1115_v62, %v1114_v61 }
 0x165   : > { %v1907_v2 = vpop.f32.mrb[60].mxu0  ;;  %v1148_v3 = vpack.c.bf16 %v1113_v0, %v1112_v63 }
 0x166   : > { %983 = vst.msk [vmem:[%s2210_s12 + $0x1f0] sm:$0xff] %vm920_vm1, %v1907_v2  ;;  %v1054_v4 = vadd.f32 %v1907_v2, %v2215_v45  ;;  %v905_v5 = vpop.f32.mrb[61].mxu0 }
 0x167   : > { %981 = vst.msk [vmem:[%s2210_s12 + $0x1e0] sm:$0xff] %vm920_vm1, %v905_v5  ;;  %v1052_v6 = vadd.f32 %v2215_v45, %v905_v5  ;;  %v1908_v7 = vpop.f32.mrb[62].mxu0  ;;  %1981 = vmatprep.mubr.bf16.mxu1 %v1148_v3 }
 0x168   : > { %984 = vst.msk [vmem:[%s2210_s12 + $0x1f8] sm:$0xff] %vm920_vm1, %v1908_v7  ;;  %v1055_v8 = vadd.f32 %v1908_v7, %v2215_v45  ;;  %v908_v9 = vpop.f32.mrb[63].mxu0  ;;  %1982 = vmatmul.mubr.bf16.gmra.mrb[56].mxu1 %v1149_v1  ;;  %v1118_v11 = vmax.f32 %v1054_v4, 0.0 }
 0x169   : > { %982 = vst.msk [vmem:[%s2210_s12 + $0x1e8] sm:$0xff] %vm920_vm1, %v908_v9  ;;  %v1053_v10 = vadd.f32 %v2215_v45, %v908_v9  ;;  %v1116_v13 = vmax.f32 %v1052_v6, 0.0 }
 0x16a   : > { %v1119_v12 = vmax.f32 %v1055_v8, 0.0 }
 0x16b   : > { %v1117_v14 = vmax.f32 %v1053_v10, 0.0 }
 0x16c   : > { %v1151_v15 = vpack.c.bf16 %v1119_v12, %v1118_v11 }
 0x16d   : > { %v1150_v16 = vpack.c.bf16 %v1117_v14, %v1116_v13 }
 0x16f   : > { %1985 = vmatprep.mubr.bf16.mxu1 %v1150_v16 }
 0x170   : > { %1986 = vmatmul.mubr.bf16.gmra.mrb[60].mxu1 %v1151_v15 }
 0x1cb   : > { %v1927_v45 = vpop.f32.mrb[0].mxu1 }
 0x1cc   : > { %v1266_v18 = vadd.f32 %v1927_v45, %v2412_v17  ;;  %v1257_v19 = vpop.f32.mrb[1].mxu1 }
 0x1cd   : > { %v1258_v20 = vadd.f32 %v2412_v17, %v1257_v19  ;;  %v1928_v21 = vpop.f32.mrb[2].mxu1 }
 0x1ce   : > { %1514 = vst.msk [vmem:[%s2419_s18 + $0x10] sm:$0xff] %vm920_vm1, %v1266_v18  ;;  %v1269_v22 = vadd.f32 %v1928_v21, %v2412_v17  ;;  %v1260_v23 = vpop.f32.mrb[3].mxu1 }
 0x1cf   : > { %1512 = vst.msk [vmem:[%s2419_s18] sm:$0xff] %vm920_vm1, %v1258_v20  ;;  %v1261_v24 = vadd.f32 %v2412_v17, %v1260_v23 }
 0x1d0   : > { %1515 = vst.msk [vmem:[%s2419_s18 + $0x18] sm:$0xff] %vm920_vm1, %v1269_v22 }
 0x1d1   : > { %1513 = vst.msk [vmem:[%s2419_s18 + $0x8] sm:$0xff] %vm920_vm1, %v1261_v24 }
 0x1d3   : > { %v1931_v25 = vpop.f32.mrb[4].mxu1 }
 0x1d4   : > { %v1282_v26 = vadd.f32 %v1931_v25, %v2412_v17  ;;  %v1273_v27 = vpop.f32.mrb[5].mxu1 }
 0x1d5   : > { %v1274_v28 = vadd.f32 %v2412_v17, %v1273_v27  ;;  %v1932_v29 = vpop.f32.mrb[6].mxu1 }
 0x1d6   : > { %1518 = vst.msk [vmem:[%s2419_s18 + $0x30] sm:$0xff] %vm920_vm1, %v1282_v26  ;;  %v1285_v30 = vadd.f32 %v1932_v29, %v2412_v17  ;;  %v1276_v31 = vpop.f32.mrb[7].mxu1 }
 0x1d7   : > { %1516 = vst.msk [vmem:[%s2419_s18 + $0x20] sm:$0xff] %vm920_vm1, %v1274_v28  ;;  %v1277_v32 = vadd.f32 %v2412_v17, %v1276_v31 }
 0x1d8   : > { %1519 = vst.msk [vmem:[%s2419_s18 + $0x38] sm:$0xff] %vm920_vm1, %v1285_v30 }
 0x1d9   : > { %1517 = vst.msk [vmem:[%s2419_s18 + $0x28] sm:$0xff] %vm920_vm1, %v1277_v32 }
 0x1db   : > { %v1935_v33 = vpop.f32.mrb[8].mxu1 }
 0x1dc   : > { %v1298_v34 = vadd.f32 %v1935_v33, %v2412_v17  ;;  %v1289_v35 = vpop.f32.mrb[9].mxu1 }
 0x1dd   : > { %v1290_v36 = vadd.f32 %v2412_v17, %v1289_v35  ;;  %v1936_v37 = vpop.f32.mrb[10].mxu1 }
 0x1de   : > { %1522 = vst.msk [vmem:[%s2419_s18 + $0x50] sm:$0xff] %vm920_vm1, %v1298_v34  ;;  %v1301_v38 = vadd.f32 %v1936_v37, %v2412_v17  ;;  %v1292_v39 = vpop.f32.mrb[11].mxu1 }
 0x1df   : > { %1520 = vst.msk [vmem:[%s2419_s18 + $0x40] sm:$0xff] %vm920_vm1, %v1290_v36  ;;  %v1293_v40 = vadd.f32 %v2412_v17, %v1292_v39 }
 0x1e0   : > { %1523 = vst.msk [vmem:[%s2419_s18 + $0x58] sm:$0xff] %vm920_vm1, %v1301_v38 }
 0x1e1   : > { %1521 = vst.msk [vmem:[%s2419_s18 + $0x48] sm:$0xff] %vm920_vm1, %v1293_v40 }
 0x1e3   : > { %v1939_v41 = vpop.f32.mrb[12].mxu1 }
 0x1e4   : > { %v1314_v42 = vadd.f32 %v1939_v41, %v2412_v17  ;;  %v1305_v43 = vpop.f32.mrb[13].mxu1 }
 0x1e5   : > { %v1306_v44 = vadd.f32 %v2412_v17, %v1305_v43  ;;  %v1940_v46 = vpop.f32.mrb[14].mxu1 }
 0x1e6   : > { %1526 = vst.msk [vmem:[%s2419_s18 + $0x70] sm:$0xff] %vm920_vm1, %v1314_v42  ;;  %v1317_v47 = vadd.f32 %v1940_v46, %v2412_v17  ;;  %v1308_v48 = vpop.f32.mrb[15].mxu1 }
 0x1e7   : > { %1524 = vst.msk [vmem:[%s2419_s18 + $0x60] sm:$0xff] %vm920_vm1, %v1306_v44  ;;  %v1309_v49 = vadd.f32 %v2412_v17, %v1308_v48 }
 0x1e8   : > { %1527 = vst.msk [vmem:[%s2419_s18 + $0x78] sm:$0xff] %vm920_vm1, %v1317_v47 }
 0x1e9   : > { %1525 = vst.msk [vmem:[%s2419_s18 + $0x68] sm:$0xff] %vm920_vm1, %v1309_v49 }
 0x1eb   : > { %v1943_v50 = vpop.f32.mrb[16].mxu1 }
 0x1ec   : > { %v1330_v51 = vadd.f32 %v1943_v50, %v2412_v17  ;;  %v1321_v52 = vpop.f32.mrb[17].mxu1 }
 0x1ed   : > { %v1322_v53 = vadd.f32 %v2412_v17, %v1321_v52  ;;  %v1944_v54 = vpop.f32.mrb[18].mxu1 }
 0x1ee   : > { %1530 = vst.msk [vmem:[%s2419_s18 + $0x90] sm:$0xff] %vm920_vm1, %v1330_v51  ;;  %v1333_v55 = vadd.f32 %v1944_v54, %v2412_v17  ;;  %v1324_v56 = vpop.f32.mrb[19].mxu1 }
 0x1ef   : > { %1528 = vst.msk [vmem:[%s2419_s18 + $0x80] sm:$0xff] %vm920_vm1, %v1322_v53  ;;  %v1325_v57 = vadd.f32 %v2412_v17, %v1324_v56 }
 0x1f0   : > { %1531 = vst.msk [vmem:[%s2419_s18 + $0x98] sm:$0xff] %vm920_vm1, %v1333_v55 }
 0x1f1   : > { %1529 = vst.msk [vmem:[%s2419_s18 + $0x88] sm:$0xff] %vm920_vm1, %v1325_v57 }
 0x1f3   : > { %v1947_v58 = vpop.f32.mrb[20].mxu1 }
 0x1f4   : > { %v1346_v59 = vadd.f32 %v1947_v58, %v2412_v17  ;;  %v1337_v60 = vpop.f32.mrb[21].mxu1 }
 0x1f5   : > { %v1338_v61 = vadd.f32 %v2412_v17, %v1337_v60  ;;  %v1948_v62 = vpop.f32.mrb[22].mxu1 }
 0x1f6   : > { %1534 = vst.msk [vmem:[%s2419_s18 + $0xb0] sm:$0xff] %vm920_vm1, %v1346_v59  ;;  %v1349_v63 = vadd.f32 %v1948_v62, %v2412_v17  ;;  %v1340_v0 = vpop.f32.mrb[23].mxu1 }
 0x1f7   : > { %1532 = vst.msk [vmem:[%s2419_s18 + $0xa0] sm:$0xff] %vm920_vm1, %v1338_v61  ;;  %v1341_v1 = vadd.f32 %v2412_v17, %v1340_v0 }
 0x1f8   : > { %1535 = vst.msk [vmem:[%s2419_s18 + $0xb8] sm:$0xff] %vm920_vm1, %v1349_v63 }
 0x1f9   : > { %1533 = vst.msk [vmem:[%s2419_s18 + $0xa8] sm:$0xff] %vm920_vm1, %v1341_v1 }
 0x1fb   : > { %v1951_v2 = vpop.f32.mrb[24].mxu1 }
 0x1fc   : > { %v1362_v3 = vadd.f32 %v1951_v2, %v2412_v17  ;;  %v1353_v4 = vpop.f32.mrb[25].mxu1 }
 0x1fd   : > { %v1354_v5 = vadd.f32 %v2412_v17, %v1353_v4  ;;  %v1952_v6 = vpop.f32.mrb[26].mxu1 }
 0x1fe   : > { %1538 = vst.msk [vmem:[%s2419_s18 + $0xd0] sm:$0xff] %vm920_vm1, %v1362_v3  ;;  %v1365_v7 = vadd.f32 %v1952_v6, %v2412_v17  ;;  %v1356_v8 = vpop.f32.mrb[27].mxu1 }
 0x1ff   : > { %1536 = vst.msk [vmem:[%s2419_s18 + $0xc0] sm:$0xff] %vm920_vm1, %v1354_v5  ;;  %v1357_v9 = vadd.f32 %v2412_v17, %v1356_v8 }
 0x200   : > { %1539 = vst.msk [vmem:[%s2419_s18 + $0xd8] sm:$0xff] %vm920_vm1, %v1365_v7 }
 0x201   : > { %1537 = vst.msk [vmem:[%s2419_s18 + $0xc8] sm:$0xff] %vm920_vm1, %v1357_v9 }
 0x203   : > { %v1955_v10 = vpop.f32.mrb[28].mxu1 }
 0x204   : > { %v1378_v11 = vadd.f32 %v1955_v10, %v2412_v17  ;;  %v1369_v12 = vpop.f32.mrb[29].mxu1 }
 0x205   : > { %v1370_v13 = vadd.f32 %v2412_v17, %v1369_v12  ;;  %v1956_v14 = vpop.f32.mrb[30].mxu1 }
 0x206   : > { %1542 = vst.msk [vmem:[%s2419_s18 + $0xf0] sm:$0xff] %vm920_vm1, %v1378_v11  ;;  %v1381_v15 = vadd.f32 %v1956_v14, %v2412_v17  ;;  %v1372_v16 = vpop.f32.mrb[31].mxu1 }
 0x207   : > { %1540 = vst.msk [vmem:[%s2419_s18 + $0xe0] sm:$0xff] %vm920_vm1, %v1370_v13  ;;  %v1373_v45 = vadd.f32 %v2412_v17, %v1372_v16 }
 0x208   : > { %1543 = vst.msk [vmem:[%s2419_s18 + $0xf8] sm:$0xff] %vm920_vm1, %v1381_v15 }
 0x209   : > { %1541 = vst.msk [vmem:[%s2419_s18 + $0xe8] sm:$0xff] %vm920_vm1, %v1373_v45 }
 0x20b   : > { %v1959_v18 = vpop.f32.mrb[32].mxu1 }
 0x20c   : > { %v1394_v19 = vadd.f32 %v1959_v18, %v2412_v17  ;;  %v1385_v20 = vpop.f32.mrb[33].mxu1 }
 0x20d   : > { %v1386_v21 = vadd.f32 %v2412_v17, %v1385_v20  ;;  %v1960_v22 = vpop.f32.mrb[34].mxu1 }
 0x20e   : > { %1546 = vst.msk [vmem:[%s2419_s18 + $0x110] sm:$0xff] %vm920_vm1, %v1394_v19  ;;  %v1397_v23 = vadd.f32 %v1960_v22, %v2412_v17  ;;  %v1388_v24 = vpop.f32.mrb[35].mxu1 }
 0x20f   : > { %1544 = vst.msk [vmem:[%s2419_s18 + $0x100] sm:$0xff] %vm920_vm1, %v1386_v21  ;;  %v1389_v25 = vadd.f32 %v2412_v17, %v1388_v24 }
 0x210   : > { %1547 = vst.msk [vmem:[%s2419_s18 + $0x118] sm:$0xff] %vm920_vm1, %v1397_v23 }
 0x211   : > { %1545 = vst.msk [vmem:[%s2419_s18 + $0x108] sm:$0xff] %vm920_vm1, %v1389_v25 }
 0x213   : > { %v1963_v26 = vpop.f32.mrb[36].mxu1 }
 0x214   : > { %v1410_v27 = vadd.f32 %v1963_v26, %v2412_v17  ;;  %v1401_v28 = vpop.f32.mrb[37].mxu1 }
 0x215   : > { %v1402_v29 = vadd.f32 %v2412_v17, %v1401_v28  ;;  %v1964_v30 = vpop.f32.mrb[38].mxu1 }
 0x216   : > { %1550 = vst.msk [vmem:[%s2419_s18 + $0x130] sm:$0xff] %vm920_vm1, %v1410_v27  ;;  %v1413_v31 = vadd.f32 %v1964_v30, %v2412_v17  ;;  %v1404_v32 = vpop.f32.mrb[39].mxu1 }
 0x217   : > { %1548 = vst.msk [vmem:[%s2419_s18 + $0x120] sm:$0xff] %vm920_vm1, %v1402_v29  ;;  %v1405_v33 = vadd.f32 %v2412_v17, %v1404_v32 }
 0x218   : > { %1551 = vst.msk [vmem:[%s2419_s18 + $0x138] sm:$0xff] %vm920_vm1, %v1413_v31 }
 0x219   : > { %1549 = vst.msk [vmem:[%s2419_s18 + $0x128] sm:$0xff] %vm920_vm1, %v1405_v33 }
 0x21b   : > { %v1967_v34 = vpop.f32.mrb[40].mxu1 }
 0x21c   : > { %v1426_v35 = vadd.f32 %v1967_v34, %v2412_v17  ;;  %v1417_v36 = vpop.f32.mrb[41].mxu1 }
 0x21d   : > { %v1418_v37 = vadd.f32 %v2412_v17, %v1417_v36  ;;  %v1968_v38 = vpop.f32.mrb[42].mxu1 }
 0x21e   : > { %1554 = vst.msk [vmem:[%s2419_s18 + $0x150] sm:$0xff] %vm920_vm1, %v1426_v35  ;;  %v1429_v39 = vadd.f32 %v1968_v38, %v2412_v17  ;;  %v1420_v40 = vpop.f32.mrb[43].mxu1 }
 0x21f   : > { %1552 = vst.msk [vmem:[%s2419_s18 + $0x140] sm:$0xff] %vm920_vm1, %v1418_v37  ;;  %v1421_v41 = vadd.f32 %v2412_v17, %v1420_v40 }
 0x220   : > { %1555 = vst.msk [vmem:[%s2419_s18 + $0x158] sm:$0xff] %vm920_vm1, %v1429_v39 }
 0x221   : > { %1553 = vst.msk [vmem:[%s2419_s18 + $0x148] sm:$0xff] %vm920_vm1, %v1421_v41 }
 0x223   : > { %v1971_v42 = vpop.f32.mrb[44].mxu1 }
 0x224   : > { %v1442_v43 = vadd.f32 %v1971_v42, %v2412_v17  ;;  %v1433_v44 = vpop.f32.mrb[45].mxu1 }
 0x225   : > { %v1434_v46 = vadd.f32 %v2412_v17, %v1433_v44  ;;  %v1972_v47 = vpop.f32.mrb[46].mxu1 }
 0x226   : > { %1558 = vst.msk [vmem:[%s2419_s18 + $0x170] sm:$0xff] %vm920_vm1, %v1442_v43  ;;  %v1445_v48 = vadd.f32 %v1972_v47, %v2412_v17  ;;  %v1436_v49 = vpop.f32.mrb[47].mxu1 }
 0x227   : > { %1556 = vst.msk [vmem:[%s2419_s18 + $0x160] sm:$0xff] %vm920_vm1, %v1434_v46  ;;  %v1437_v50 = vadd.f32 %v2412_v17, %v1436_v49 }
 0x228   : > { %1559 = vst.msk [vmem:[%s2419_s18 + $0x178] sm:$0xff] %vm920_vm1, %v1445_v48 }
 0x229   : > { %1557 = vst.msk [vmem:[%s2419_s18 + $0x168] sm:$0xff] %vm920_vm1, %v1437_v50 }
 0x22b   : > { %v1975_v51 = vpop.f32.mrb[48].mxu1 }
 0x22c   : > { %v1458_v52 = vadd.f32 %v1975_v51, %v2412_v17  ;;  %v1449_v53 = vpop.f32.mrb[49].mxu1 }
 0x22d   : > { %v1450_v54 = vadd.f32 %v2412_v17, %v1449_v53  ;;  %v1976_v55 = vpop.f32.mrb[50].mxu1 }
 0x22e   : > { %1562 = vst.msk [vmem:[%s2419_s18 + $0x190] sm:$0xff] %vm920_vm1, %v1458_v52  ;;  %v1461_v56 = vadd.f32 %v1976_v55, %v2412_v17  ;;  %v1452_v57 = vpop.f32.mrb[51].mxu1 }
 0x22f   : > { %1560 = vst.msk [vmem:[%s2419_s18 + $0x180] sm:$0xff] %vm920_vm1, %v1450_v54  ;;  %v1453_v58 = vadd.f32 %v2412_v17, %v1452_v57 }
 0x230   : > { %1563 = vst.msk [vmem:[%s2419_s18 + $0x198] sm:$0xff] %vm920_vm1, %v1461_v56 }
 0x231   : > { %1561 = vst.msk [vmem:[%s2419_s18 + $0x188] sm:$0xff] %vm920_vm1, %v1453_v58 }
 0x233   : > { %v1979_v59 = vpop.f32.mrb[52].mxu1 }
 0x234   : > { %v1474_v60 = vadd.f32 %v1979_v59, %v2412_v17  ;;  %v1465_v61 = vpop.f32.mrb[53].mxu1 }
 0x235   : > { %v1466_v62 = vadd.f32 %v2412_v17, %v1465_v61  ;;  %v1980_v63 = vpop.f32.mrb[54].mxu1 }
 0x236   : > { %1566 = vst.msk [vmem:[%s2419_s18 + $0x1b0] sm:$0xff] %vm920_vm1, %v1474_v60  ;;  %v1477_v0 = vadd.f32 %v1980_v63, %v2412_v17  ;;  %v1468_v1 = vpop.f32.mrb[55].mxu1 }
 0x237   : > { %1564 = vst.msk [vmem:[%s2419_s18 + $0x1a0] sm:$0xff] %vm920_vm1, %v1466_v62  ;;  %v1469_v2 = vadd.f32 %v2412_v17, %v1468_v1 }
 0x238   : > { %1567 = vst.msk [vmem:[%s2419_s18 + $0x1b8] sm:$0xff] %vm920_vm1, %v1477_v0 }
 0x239   : > { %1565 = vst.msk [vmem:[%s2419_s18 + $0x1a8] sm:$0xff] %vm920_vm1, %v1469_v2 }
 0x23b   : > { %v1983_v3 = vpop.f32.mrb[56].mxu1 }
 0x23c   : > { %v1490_v4 = vadd.f32 %v1983_v3, %v2412_v17  ;;  %v1481_v5 = vpop.f32.mrb[57].mxu1 }
 0x23d   : > { %v1482_v6 = vadd.f32 %v2412_v17, %v1481_v5  ;;  %v1984_v7 = vpop.f32.mrb[58].mxu1 }
 0x23e   : > { %1570 = vst.msk [vmem:[%s2419_s18 + $0x1d0] sm:$0xff] %vm920_vm1, %v1490_v4  ;;  %v1493_v8 = vadd.f32 %v1984_v7, %v2412_v17  ;;  %v1484_v9 = vpop.f32.mrb[59].mxu1 }
 0x23f   : > { %1568 = vst.msk [vmem:[%s2419_s18 + $0x1c0] sm:$0xff] %vm920_vm1, %v1482_v6  ;;  %v1485_v10 = vadd.f32 %v2412_v17, %v1484_v9 }
 0x240   : > { %1571 = vst.msk [vmem:[%s2419_s18 + $0x1d8] sm:$0xff] %vm920_vm1, %v1493_v8 }
 0x241   : > { %1569 = vst.msk [vmem:[%s2419_s18 + $0x1c8] sm:$0xff] %vm920_vm1, %v1485_v10 }
 0x243   : > { %v1987_v11 = vpop.f32.mrb[60].mxu1 }
 0x244   : > { %v1506_v12 = vadd.f32 %v1987_v11, %v2412_v17  ;;  %v1497_v13 = vpop.f32.mrb[61].mxu1 }
 0x245   : > { %v1498_v14 = vadd.f32 %v2412_v17, %v1497_v13  ;;  %v1988_v15 = vpop.f32.mrb[62].mxu1 }
 0x246   : > { %1574 = vst.msk [vmem:[%s2419_s18 + $0x1f0] sm:$0xff] %vm920_vm1, %v1506_v12  ;;  %v1509_v16 = vadd.f32 %v1988_v15, %v2412_v17  ;;  %v1500_v45 = vpop.f32.mrb[63].mxu1 }
 0x247   : > { %1572 = vst.msk [vmem:[%s2419_s18 + $0x1e0] sm:$0xff] %vm920_vm1, %v1498_v14  ;;  %v1501_v18 = vadd.f32 %v2412_v17, %v1500_v45 }
 0x248   : > { %1575 = vst.msk [vmem:[%s2419_s18 + $0x1f8] sm:$0xff] %vm920_vm1, %v1509_v16 }
 0x249   : > { %1573 = vst.msk [vmem:[%s2419_s18 + $0x1e8] sm:$0xff] %vm920_vm1, %v1501_v18 }
 0x24a PF: > { %s17_s21 = sadd.s32 1, %s2048_s21  }
 0x24b   : > { %p14_p4 = scmp.ge.s32.totalorder %s17_s21, 4  }
 0x24d   :  { %16 = sbr.rel (!%p14_p4) target bundleno = 1 (0x1), region = 82 }

</bundles_post_ra>
